<compile_context>
chip_gen: v5e
topology: v5e:2x2
jax: 0.10.0
libtpu: 0.0.40
codegen_flags: <defaults>
</compile_context>

<pallas_src>
import functools

import jax
import jax.numpy as jnp
from jax.experimental import pallas as pl
from jax.experimental.pallas import tpu as pltpu


def _pos_enc_kernel(x_ref, o_ref, *, k: int):
    x = x_ref[...]                      # (TB, F)
    if k == 0:
        o_ref[...] = x
        return

    xf = x.astype(jnp.float32)
    # Single sin/cos polynomial pass; higher octaves via double-angle (VALU).
    s = jnp.sin(xf)
    c = jnp.cos(xf)
    pieces = [xf, s, c]
    for _ in range(k - 1):
        s, c = 2.0 * s * c, 1.0 - 2.0 * s * s
        pieces.append(s)
        pieces.append(c)

    # One lane-concatenate, one lane-dense full-block store (torch.cat order).
    o_ref[...] = jnp.concatenate(pieces, axis=-1).astype(o_ref.dtype)


def _round_up(n: int, m: int) -> int:
    return ((n + m - 1) // m) * m


def _pick_batch_tile(batch: int, in_f: int, out_f: int, itemsize: int,
                     vmem_budget_bytes: int = 20 << 20) -> int:
    """Largest batch tile (multiple of 8) whose lane-padded, double-buffered
    I/O tiles plus live in-kernel temporaries fit the VMEM budget, capped so
    the grid has at least 2 (prefer 4) steps for pipelining / dual-TC v7x."""
    if batch <= 8:
        return batch                                    # full-dim block is legal
    in_pad = _round_up(in_f, 128)
    out_pad = _round_up(out_f, 128)
    # 2x(in+out): double-buffered DMA tiles. (in + 2*out): live temporaries
    # (x + 2k+1 pieces ~= out, plus the assembled output value before store).
    row_bytes = (2 * (in_pad + out_pad) + (in_pad + 2 * out_pad)) * itemsize
    tb = max(8, (vmem_budget_bytes // row_bytes) // 8 * 8)
    # Minimum pipeline depth: >= 2 grid steps, >= 4 when batch is large enough.
    min_steps = 2 if batch <= 256 else 4
    cap = max(8, _round_up(pl.cdiv(batch, min_steps), 8))
    tb = min(tb, cap)
    return min(tb, batch)


def basic_positional_encoding(x: jax.Array, k: int, *, block_b=None) -> jax.Array:
    """Pallas wrapper. x: (B, in_features) -> (B, (2k+1)*in_features)."""
    B, F = x.shape
    out_f = (2 * k + 1) * F

    if block_b is not None:
        tb = int(block_b)
        if tb >= B:
            tb = B                                      # full-dim block is legal
        else:
            tb = max(8, (tb // 8) * 8)                  # enforce (8,128) rule
    else:
        tb = _pick_batch_tile(B, F, out_f, x.dtype.itemsize)
    tb = min(tb, B)

    grid = (pl.cdiv(B, tb),)
    kernel = functools.partial(_pos_enc_kernel, k=k)
    return pl.pallas_call(
        kernel,
        out_shape=jax.ShapeDtypeStruct((B, out_f), x.dtype),
        grid_spec=pltpu.PrefetchScalarGridSpec(
            num_scalar_prefetch=0,
            grid=grid,
            in_specs=[pl.BlockSpec((tb, F), lambda i: (i, 0))],
            out_specs=pl.BlockSpec((tb, out_f), lambda i: (i, 0)),
        ),
        compiler_params=pltpu.CompilerParams(
            dimension_semantics=("parallel",),
            vmem_limit_bytes=32 << 20,
        ),
    )(x)


def _reference(x: jnp.ndarray, k: int) -> jnp.ndarray:
    out = [x]
    for j in range(k):
        out.append(jnp.sin(2.0 ** j * x))
        out.append(jnp.cos(2.0 ** j * x))
    return jnp.concatenate(out, axis=1)


if __name__ == "__main__":
    key = jax.random.PRNGKey(0)
    B, in_features, k = 64, 32, 4       # out_features = 4*2*32 + 32 = 288
    x = jax.random.normal(key, (B, in_features), dtype=jnp.float32)
    ref = _reference(x, k)

    # Explicit small tile so the parallel grid / pipelining path is exercised
    # (grid = (4,)).
    out_tiled = jax.block_until_ready(basic_positional_encoding(x, k, block_b=16))
    # Auto-picked tile path (grid >= 2 by construction).
    out_auto = jax.block_until_ready(basic_positional_encoding(x, k))

    expected_shape = (B, (2 * k + 1) * in_features)
    assert out_tiled.shape == expected_shape, out_tiled.shape
    assert out_auto.shape == expected_shape, out_auto.shape
    assert jnp.allclose(out_tiled, ref, atol=1e-4, rtol=1e-4), "tiled mismatch vs reference"
    assert jnp.allclose(out_auto, ref, atol=1e-4, rtol=1e-4), "auto mismatch vs reference"

    print("KERNEL_OK")
</pallas_src>

<mosaic_0001>
module attributes {stable_mosaic.version = 11 : i64} {
  func.func @_pos_enc_kernel(%arg0: i32, %arg1: memref<16x32xf32, #tpu.memory_space<vmem>>, %arg2: memref<16x288xf32, #tpu.memory_space<vmem>>) attributes {dimension_semantics = [#tpu.dimension_semantics<parallel>], iteration_bounds = array<i64: 4>, scalar_prefetch = 0 : i64, scratch_operands = 0 : i64, tpu.core_type = #tpu.core_type<tc>, window_params = [{transform_indices = @transform_0, window_bounds = array<i64: 16, 32>}, {transform_indices = @transform_1, window_bounds = array<i64: 16, 288>}]} {
    %c0 = arith.constant 0 : index
    %c0_0 = arith.constant 0 : index
    %0 = vector.load %arg1[%c0, %c0_0] : memref<16x32xf32, #tpu.memory_space<vmem>>, vector<16x32xf32>
    %1 = math.sin %0 : vector<16x32xf32>
    %2 = math.cos %0 : vector<16x32xf32>
    %cst = arith.constant 2.000000e+00 : f32
    %3 = vector.broadcast %cst : f32 to vector<16x32xf32>
    %4 = arith.mulf %3, %1 : vector<16x32xf32>
    %5 = arith.mulf %4, %2 : vector<16x32xf32>
    %cst_1 = arith.constant 2.000000e+00 : f32
    %6 = vector.broadcast %cst_1 : f32 to vector<16x32xf32>
    %7 = arith.mulf %6, %1 : vector<16x32xf32>
    %8 = arith.mulf %7, %1 : vector<16x32xf32>
    %cst_2 = arith.constant 1.000000e+00 : f32
    %9 = vector.broadcast %cst_2 : f32 to vector<16x32xf32>
    %10 = arith.subf %9, %8 : vector<16x32xf32>
    %cst_3 = arith.constant 2.000000e+00 : f32
    %11 = vector.broadcast %cst_3 : f32 to vector<16x32xf32>
    %12 = arith.mulf %11, %5 : vector<16x32xf32>
    %13 = arith.mulf %12, %10 : vector<16x32xf32>
    %cst_4 = arith.constant 2.000000e+00 : f32
    %14 = vector.broadcast %cst_4 : f32 to vector<16x32xf32>
    %15 = arith.mulf %14, %5 : vector<16x32xf32>
    %16 = arith.mulf %15, %5 : vector<16x32xf32>
    %cst_5 = arith.constant 1.000000e+00 : f32
    %17 = vector.broadcast %cst_5 : f32 to vector<16x32xf32>
    %18 = arith.subf %17, %16 : vector<16x32xf32>
    %cst_6 = arith.constant 2.000000e+00 : f32
    %19 = vector.broadcast %cst_6 : f32 to vector<16x32xf32>
    %20 = arith.mulf %19, %13 : vector<16x32xf32>
    %21 = arith.mulf %20, %18 : vector<16x32xf32>
    %cst_7 = arith.constant 2.000000e+00 : f32
    %22 = vector.broadcast %cst_7 : f32 to vector<16x32xf32>
    %23 = arith.mulf %22, %13 : vector<16x32xf32>
    %24 = arith.mulf %23, %13 : vector<16x32xf32>
    %cst_8 = arith.constant 1.000000e+00 : f32
    %25 = vector.broadcast %cst_8 : f32 to vector<16x32xf32>
    %26 = arith.subf %25, %24 : vector<16x32xf32>
    %27 = tpu.concatenate %0, %1, %2, %5, %10, %13, %18, %21, %26 in 1 : vector<16x32xf32>, vector<16x32xf32>, vector<16x32xf32>, vector<16x32xf32>, vector<16x32xf32>, vector<16x32xf32>, vector<16x32xf32>, vector<16x32xf32>, vector<16x32xf32> -> vector<16x288xf32>
    %c0_9 = arith.constant 0 : index
    %c0_10 = arith.constant 0 : index
    %28 = vector.load %arg2[%c0_9, %c0_10] : memref<16x288xf32, #tpu.memory_space<vmem>>, vector<16x288xf32>
    tpu.vector_store %arg2[%c0_9, %c0_10], %27 {strides = array<i32>} : memref<16x288xf32, #tpu.memory_space<vmem>>, vector<16x288xf32>,
    return
  }
  func.func @transform_0(%arg0: i32) -> (i32, i32) {
    %c0_i32 = arith.constant 0 : i32
    %c0_i32_0 = arith.constant 0 : i32
    return %arg0, %c0_i32 : i32, i32
  }
  func.func @transform_1(%arg0: i32) -> (i32, i32) {
    %c0_i32 = arith.constant 0 : i32
    %c0_i32_0 = arith.constant 0 : i32
    return %arg0, %c0_i32 : i32, i32
  }
}

</mosaic_0001>

<bundles_post_ra>
// kernel: tpu_custom_call.1
= control target key start
LH: loop header
LB: loop body
LE: loop exit
PB: predicated region body
PF: predicated region fallthrough
CT: control target
= control target key end

     0   :  { %6 = vsyncpa [#allocation3], 0  ;;  %s1369_s0 = inlined_call_operand.vmem [shape: f32[64,32], index: 0, kind: input, shape index: {}]   ;;  %s1370_s1 = inlined_call_operand.hbm [shape: f32[64,288], index: 1, kind: output, shape index: {}]  }
   0x1   :  { %8 = vsyncpa [#allocation3 + $0x1], 0  ;;  %s1072_s6 = smov 0   ;;  %s1074_s7 = smov 0  }
   0x2   :  { %s1076_s8 = smov 0   ;;  %s1078_s9 = smov 0  }
   0x3 LB: > { %s1093_s10 = sadd.s32 4294967295, %s1048_s9   ;;  %s910_s11 = sadd.s32 4294967294, %s1048_s9   ;;  %s1048_s9 = sphi %s1078_s9, %s1378_s9   ;;  %s1044_s8 = sphi %s1076_s8, %s1377_s8   ;;  %s1040_s7 = sphi %s1074_s7, %s1376_s7   ;;  %s1036_s6 = sphi %s1072_s6, %s1375_s6  }
   0x4   : > { %s1097_s12 = sadd.s32 1, %s1048_s9   ;;  %s47_s13 = sadd.s32 1, %s1044_s8 }
   0x5   : > { %s44_s14 = ssub.s32 %s1048_s9, %s1097_s12  ;;  %p57_p0 = scmp.ne.s32.totalorder %s1044_s8, %s1040_s7 }
   0x6   : > { %p45_p1 = scmp.eq.s32.totalorder %s44_s14, 0  ;;  %p58_p2 = scmp.eq.s32.totalorder %s1093_s10, 3 }
   0x7   : > { %p63_p3 = scmp.ne.s32.totalorder %s1040_s7, %s1036_s6  ;;  %p64_p4 = scmp.eq.s32.totalorder %s910_s11, 3 }
   0x8   : > { %s1108_s15 = scalar_select %p45_p1, %s1044_s8, %s47_s13  }
   0x9   : > { %p1110_p5 = por %p58_p2, %p57_p0  ;;  %p1114_p6 = por %p64_p4, %p63_p3 }
   0xa   : > { %p913_p7 = scmp.ge.s32.totalorder %s1048_s9, 1  ;;  %p91_p8 = scmp.lt.s32.totalorder %s1048_s9, 5 }
   0xc   : > { %p92_p9 = pnand %p913_p7, %p91_p8 }
   0xd   : > { %s914_s18 = sshll.u32 (!%p92_p9), %s1093_s10, 1  ;;  %s1057_s23 = smov (!%p92_p9), 32  }
   0xe   : > { %95 = sbr.rel (%p92_p9) target bundleno = 281 (0x119), region = 24  ;;  %p112_p10 = scmp.lt.s32.totalorder (!%p92_p9), %s914_s18, 7 }
   0xf   : > { %s1058_s24 = smov (!%p92_p9), 64   ;;  %s1059_s25 = smov (!%p92_p9), 96  }
  0x10   : > { %s108_s26 = sand.u32 (!%p92_p9), 1, %s1040_s7   ;;  %s934_s29 = smul.u32 (!%p92_p9), 48, %s1093_s10 }
  0x11   : > { %s933_s27 = smul.u32 (!%p92_p9), 48, %s108_s26  ;;  %s832_s10 = scalar_lea.sflag (!%p92_p9), [#allocation3], %s108_s26 }
  0x12   : > { %s844_s3 = scalar_lea.hbm (!%p92_p9), %s1370_s1, %s934_s29 }
  0x13   : > { %s1380_s18 = smov (!%p112_p10, %s914_s18), 7  ;;  %v1050_v23 = vmov 683565275   ;;  %v1051_v25 = vmov 2475754826   ;;  %s1309_s28 = scalar_lea.vmem [#allocation2], %s933_s27 }
  0x14   : > { %s915_s19 = sshll.u32 %s1380_s18, 3  ;;  %v1052_v27 = vmov 2131351028   ;;  %v1053_v29 = vmov 2102212464   ;;  %s845_s4 = sshll.u32 %s1309_s28, 4  ;;  %s846_s4 = int_to_ptr.vmem [resolvable:$true] %s845_s4 }
  0x15   : > { %s115_s22 = scalar_lea.vmem %s1369_s0, %s915_s19  ;;  %v1054_v31 = vmov 920167782   ;;  %v1055_v40 = vmov 1326507024   ;;  %s847_s5 = sshll.u32 %s844_s3, 4  ;;  %s848_s5 = int_to_ptr.hbm [resolvable:$true] %s847_s5 }
  0x16   : > { %v1124_v0 = vld [vmem:[%s115_s22] sm:$0xff]  ;;  %v1126_v1 = vld [vmem:[%s115_s22 + $0x8] sm:$0xff]  ;;  %s1000_s11 = sshra.s32 %s848_s5, 4  ;;  %s1006_s19 = scalar_lea.hbm %s1370_s1, 192  ;;  %s1001_s11 = int_to_ptr.hbm [resolvable:$true] %s1000_s11 }
  0x17   : > { %v120_v2 = vand.u32 2147483647, %v1124_v0  ;;  %v123_v3 = vand.u32 2139095040, %v1124_v0  ;;  %v275_v4 = vand.u32 2147483647, %v1126_v1  ;;  %v278_v5 = vand.u32 2139095040, %v1126_v1  ;;  %p1007_p0 = scmp.lt.s32.totalorder %s1001_s11, %s1370_s1 }
  0x18   : > { %s1002_s13 = scalar_lea.hbm %s1001_s11, 48 }
  0x19   : > { %v124_v6 = vshrl.u32 %v123_v3, 23  ;;  %v127_v7 = vand.u32 8388607, %v120_v2  ;;  %v279_v8 = vshrl.u32 %v278_v5, 23  ;;  %v282_v12 = vand.u32 8388607, %v275_v4  ;;  %p1003_p11 = scmp.ne.s32.totalorder %s1001_s11, %s1002_s13  ;;  %p1008_p1 = scmp.lt.s32.totalorder %s1006_s19, %s1002_s13 }
  0x1b   : > { %v916_v9 = vadd.s32 4294967169, %v124_v6  ;;  %v128_v10 = vor.u32 8388608, %v127_v7  ;;  %v919_v11 = vadd.s32 4294967169, %v279_v8  ;;  %v283_v17 = vor.u32 8388608, %v282_v12  ;;  %p1004_p12 = pnand %p1003_p11, %p1110_p5  ;;  %p1009_p2 = por %p1008_p1, %p1007_p0 }
  0x1d   : > { %v130_v13 = vadd.s32 1, %v916_v9  ;;  %v285_v14 = vadd.s32 1, %v919_v11  ;;  %v1136_v16 = vshll.u32 %v128_v10, 8  ;;  %v1146_v34 = vshll.u32 %v283_v17, 8  ;;  %p1005_p13 = pneg %p1004_p12 }
  0x1f   : > { %vm131_vm0 = vcmp.gt.s32.totalorder %v130_v13, 0  ;;  %vm286_vm1 = vcmp.gt.s32.totalorder %v285_v14, 0  ;;  %v169_v33 = vand.u32 65535, %v1136_v16  ;;  %v170_v38 = vshrl.u32 %v1136_v16, 16  ;;  %p1010_p3 = pnand %p1009_p2, %p1005_p13 }
  0x20   : > { %v132_v15 = vsel %vm131_vm0, %v130_v13, 0  ;;  %v287_v19 = vsel %vm286_vm1, %v285_v14, 0 }
  0x21   : > { %v134_v18 = vand.u32 31, %v132_v15  ;;  %v1138_v20 = vshrl.u32 %v132_v15, 5  ;;  %v1140_v21 = vand.u32 31, %v287_v19  ;;  %v1164_v51 = vshrl.u32 %v287_v19, 5 }
  0x23   : > { %v135_v22 = vsub.s32 32, %v134_v18  ;;  %v137_v24 = vshll.u32 %v1050_v23, %v134_v18  ;;  %v140_v26 = vshll.u32 %v1051_v25, %v134_v18  ;;  %v143_v28 = vshll.u32 %v1052_v27, %v134_v18 }
  0x24   : > { %v146_v30 = vshll.u32 %v1053_v29, %v134_v18  ;;  %v149_v32 = vshll.u32 %v1054_v31, %v134_v18  ;;  %vm152_vm2 = vcmp.lt.s32.totalorder %v1138_v20, 1  ;;  %vm155_vm3 = vcmp.lt.s32.totalorder %v1138_v20, 4 }
  0x25   : > { %v138_v35 = vshrl.u32 %v1051_v25, %v135_v22  ;;  %v141_v36 = vshrl.u32 %v1052_v27, %v135_v22  ;;  %v144_v37 = vshrl.u32 %v1053_v29, %v135_v22  ;;  %v147_v39 = vshrl.u32 %v1054_v31, %v135_v22 }
  0x26   : > { %v150_v41 = vshrl.u32 %v1055_v40, %v135_v22  ;;  %v1155_v45 = vsub.s32 32, %v1140_v21  ;;  %v136_v46 = vshrl.u32 %v1050_v23, %v135_v22  ;;  %vm154_vm4 = vcmp.lt.s32.totalorder %v1138_v20, 3 }
  0x27   : > { %v139_v42 = vor.u32 %v138_v35, %v137_v24  ;;  %v142_v43 = vor.u32 %v141_v36, %v140_v26  ;;  %v145_v44 = vor.u32 %v144_v37, %v143_v28  ;;  %v148_v47 = vor.u32 %v147_v39, %v146_v30 }
  0x28   : > { %v151_v48 = vor.u32 %v150_v41, %v149_v32  ;;  %vm153_vm5 = vcmp.lt.s32.totalorder %v1138_v20, 2  ;;  %v292_v54 = vshll.u32 %v1050_v23, %v1140_v21  ;;  %v295_v55 = vshll.u32 %v1051_v25, %v1140_v21 }
  0x29   : > { %v160_v49 = vsel %vm152_vm2, %v139_v42, %v142_v43  ;;  %v164_v50 = vsel %vm152_vm2, %v142_v43, %v145_v44  ;;  %v161_v52 = vsel %vm155_vm3, %v148_v47, 920167782  ;;  %v157_v56 = vsel %vm155_vm3, %v145_v44, 2102212464 }
  0x2a   : > { %v165_v53 = vsel %vm155_vm3, %v151_v48, 1326507024  ;;  %v162_v57 = vsel %vm154_vm4, %v145_v44, %v161_v52  ;;  %v293_v59 = vshrl.u32 %v1051_v25, %v1155_v45  ;;  %v156_v60 = vsel %vm152_vm2, %v136_v46, %v139_v42 }
  0x2b   : > { %v166_v58 = vsel %vm154_vm4, %v148_v47, %v165_v53  ;;  %v163_v61 = vsel %vm153_vm5, %v160_v49, %v162_v57  ;;  %v296_v63 = vshrl.u32 %v1052_v27, %v1155_v45  ;;  %v158_v8 = vsel %vm154_vm4, %v142_v43, %v157_v56 }
  0x2c   : > { %v167_v62 = vsel %vm153_vm5, %v164_v50, %v166_v58  ;;  %v193_v6 = vand.u32 65535, %v163_v61  ;;  %v194_v7 = vshrl.u32 %v163_v61, 16  ;;  %v1189_v9 = vor.u32 %v293_v59, %v292_v54 }
  0x2d   : > { %v171_v3 = vand.u32 65535, %v167_v62  ;;  %v172_v5 = vshrl.u32 %v167_v62, 16  ;;  %v1191_v10 = vor.u32 %v296_v63, %v295_v55  ;;  %v298_v11 = vshll.u32 %v1052_v27, %v1140_v21 }
  0x2e   : > { %v299_v15 = vshrl.u32 %v1053_v29, %v1155_v45  ;;  %v195_v18 = vmul.u32 %v193_v6, %v169_v33  ;;  %v196_v19 = vmul.u32 %v194_v7, %v169_v33  ;;  %v197_v22 = vmul.u32 %v193_v6, %v170_v38 }
  0x2f   : > { %v173_v12 = vmul.u32 %v171_v3, %v169_v33  ;;  %v174_v13 = vmul.u32 %v172_v5, %v169_v33  ;;  %v175_v14 = vmul.u32 %v171_v3, %v170_v38  ;;  %v176_v17 = vmul.u32 %v172_v5, %v170_v38 }
  0x30   : > { %v198_v28 = vmul.u32 %v194_v7, %v170_v38  ;;  %v199_v32 = vshll.u32 %v196_v19, 16  ;;  %v200_v35 = vshrl.u32 %v196_v19, 16  ;;  %v201_v36 = vshll.u32 %v197_v22, 16 }
  0x31   : > { %v177_v24 = vshll.u32 %v174_v13, 16  ;;  %v178_v25 = vshrl.u32 %v174_v13, 16  ;;  %v179_v26 = vshll.u32 %v175_v14, 16  ;;  %v180_v30 = vshrl.u32 %v175_v14, 16 }
  0x32   : > { %v202_v37 = vshrl.u32 %v197_v22, 16  ;;  %v301_v39 = vshll.u32 %v1053_v29, %v1140_v21  ;;  %v1056_v41 = vmov 0   ;;  %vm203_vm7 = vc.u32 %v195_v18, %v199_v32 }
  0x33   : > { %vm181_vm6 = vc.u32 %v173_v12, %v177_v24  ;;  %v183_v27 = vadd.s32 %v177_v24, %v173_v12  ;;  %v205_v33 = vadd.s32 %v199_v32, %v195_v18  ;;  %v302_v43 = vshrl.u32 %v1054_v31, %v1155_v45 }
  0x34   : > { %v182_v42 = vsel %vm181_vm6, 1, %v1056_v41  ;;  %v204_v38 = vsel %vm203_vm7, 1, %v1056_v41  ;;  %v304_v46 = vshll.u32 %v1054_v31, %v1140_v21  ;;  %v300_v29 = vor.u32 %v299_v15, %v298_v11 }
  0x35   : > { %v184_v44 = vadd.s32 %v182_v42, %v176_v17  ;;  %vm185_vm8 = vc.u32 %v183_v27, %v179_v26  ;;  %v206_v48 = vadd.s32 %v204_v38, %v198_v28  ;;  %vm207_vm9 = vc.u32 %v205_v33, %v201_v36 }
  0x36   : > { %v186_v47 = vsel %vm185_vm8, 1, %v1056_v41  ;;  %v208_v50 = vsel %vm207_vm9, 1, %v1056_v41  ;;  %v303_v52 = vor.u32 %v302_v43, %v301_v39  ;;  %v305_v53 = vshrl.u32 %v1055_v40, %v1155_v45 }
  0x37   : > { %v188_v49 = vadd.s32 %v186_v47, %v184_v44  ;;  %v1208_v54 = vadd.s32 %v205_v33, %v201_v36  ;;  %v210_v55 = vadd.s32 %v208_v50, %v206_v48  ;;  %vm307_vm10 = vcmp.lt.s32.totalorder %v1164_v51, 1 }
  0x38   : > { %vm309_vm11 = vcmp.lt.s32.totalorder %v1164_v51, 3  ;;  %v306_v31 = vor.u32 %v305_v53, %v304_v46  ;;  %vm308_vm12 = vcmp.lt.s32.totalorder %v1164_v51, 2  ;;  %vm310_vm13 = vcmp.lt.s32.totalorder %v1164_v51, 4 }
  0x39   : > { %v189_v21 = vadd.s32 %v188_v49, %v178_v25  ;;  %v159_v56 = vsel %vm153_vm5, %v156_v60, %v158_v8  ;;  %v211_v57 = vadd.s32 %v210_v55, %v200_v35  ;;  %v315_v40 = vsel %vm307_vm10, %v1189_v9, %v1191_v10 }
  0x3a   : > { %v316_v58 = vsel %vm310_vm13, %v303_v52, 920167782  ;;  %v319_v62 = vsel %vm307_vm10, %v1191_v10, %v300_v29  ;;  %v325_v20 = vshrl.u32 %v1146_v34, 16  ;;  %v320_v3 = vsel %vm310_vm13, %v306_v31, 1326507024 }
  0x3b   : > { %v1222_v59 = vadd.s32 %v189_v21, %v180_v30  ;;  %v317_v61 = vsel %vm309_vm11, %v300_v29, %v316_v58  ;;  %v212_v60 = vadd.s32 %v211_v57, %v202_v37  ;;  %v324_v5 = vand.u32 65535, %v1146_v34 }
  0x3c   : > { %v318_v63 = vsel %vm308_vm12, %v315_v40, %v317_v61  ;;  %v213_v6 = vmul.u32 %v1136_v16, %v159_v56  ;;  %v321_v7 = vsel %vm309_vm11, %v303_v52, %v320_v3  ;;  %v291_v39 = vshrl.u32 %v1050_v23, %v1155_v45 }
  0x3d   : > { %vm215_vm14 = vc.u32 %v1222_v59, %v1208_v54  ;;  %v348_v8 = vand.u32 65535, %v318_v63  ;;  %v216_v11 = vadd.s32 1, %v212_v60  ;;  %v322_v12 = vsel %vm308_vm12, %v319_v62, %v321_v7 }
  0x3e   : > { %v349_v13 = vshrl.u32 %v318_v63, 16  ;;  %v326_v14 = vand.u32 65535, %v322_v12  ;;  %v327_v15 = vshrl.u32 %v322_v12, 16  ;;  %v312_v38 = vsel %vm310_vm13, %v300_v29, 2102212464 }
  0x3f   : > { %v352_v17 = vmul.u32 %v348_v8, %v325_v20  ;;  %v217_v18 = vsel %vm215_vm14, %v216_v11, %v212_v60  ;;  %v350_v19 = vmul.u32 %v348_v8, %v324_v5  ;;  %v311_v23 = vsel %vm307_vm10, %v291_v39, %v1189_v9 }
  0x40   : > { %v351_v22 = vmul.u32 %v349_v13, %v324_v5  ;;  %v218_v24 = vadd.s32 %v217_v18, %v213_v6  ;;  %v328_v16 = vmul.u32 %v326_v14, %v324_v5  ;;  %v329_v25 = vmul.u32 %v327_v15, %v324_v5 }
  0x41   : > { %v330_v26 = vmul.u32 %v326_v14, %v325_v20  ;;  %v353_v28 = vmul.u32 %v349_v13, %v325_v20  ;;  %v356_v32 = vshll.u32 %v352_v17, 16  ;;  %v331_v36 = vmul.u32 %v327_v15, %v325_v20 }
  0x42   : > { %v354_v30 = vshll.u32 %v351_v22, 16  ;;  %v219_v35 = vadd.s32 536870912, %v218_v24  ;;  %v332_v27 = vshll.u32 %v329_v25, 16  ;;  %v333_v49 = vshrl.u32 %v329_v25, 16 }
  0x43   : > { %v334_v37 = vshll.u32 %v330_v26, 16  ;;  %v355_v52 = vshrl.u32 %v351_v22, 16  ;;  %v313_v29 = vsel %vm309_vm11, %v1191_v10, %v312_v38  ;;  %v335_v21 = vshrl.u32 %v330_v26, 16 }
  0x44   : > { %vm358_vm15 = vc.u32 %v350_v19, %v354_v30  ;;  %v360_v42 = vadd.s32 %v354_v30, %v350_v19  ;;  %v1244_v33 = vshrl.u32 %v219_v35, 30  ;;  %vm336_vm0 = vc.u32 %v328_v16, %v332_v27 }
  0x45   : > { %v338_v43 = vadd.s32 %v332_v27, %v328_v16  ;;  %v359_v44 = vsel %vm358_vm15, 1, %v1056_v41  ;;  %v337_v46 = vsel %vm336_vm0, 1, %v1056_v41  ;;  %v357_v56 = vshrl.u32 %v352_v17, 16 }
  0x46   : > { %v361_v47 = vadd.s32 %v359_v44, %v353_v28  ;;  %vm362_vm1 = vc.u32 %v360_v42, %v356_v32  ;;  %v221_v48 = vshll.u32 %v1244_v33, 30  ;;  %v339_v50 = vadd.s32 %v337_v46, %v331_v36 }
  0x47   : > { %vm340_vm2 = vc.u32 %v338_v43, %v334_v37  ;;  %v363_v53 = vsel %vm362_vm1, 1, %v1056_v41  ;;  %v364_v61 = vadd.s32 %v360_v42, %v356_v32  ;;  %v314_v9 = vsel %vm308_vm12, %v311_v23, %v313_v29 }
  0x48   : > { %v341_v45 = vsel %vm340_vm2, 1, %v1056_v41  ;;  %v222_v55 = vsub.s32 %v218_v24, %v221_v48  ;;  %v365_v57 = vadd.s32 %v363_v53, %v361_v47  ;;  %v368_v3 = vmul.u32 %v1146_v34, %v314_v9 }
  0x49   : > { %v343_v31 = vadd.s32 %v341_v45, %v339_v50  ;;  %v214_v6 = vadd.s32 %v1208_v54, %v1222_v59  ;;  %vm122_vm7 = vcmp.lt.s32.totalorder %v1124_v0, 0  ;;  %v244_v28 = vsub.s32 4, %v1244_v33 }
  0x4a   : > { %vm223_vm3 = vcmp.lt.s32.totalorder %v222_v55, 0  ;;  %v224_v40 = vsub.s32 0, %v222_v55  ;;  %v366_v62 = vadd.s32 %v365_v57, %v355_v52  ;;  %vm121_vm8 = vcmp.le.f32.partialorder %v120_v2, 0.7853982 }
  0x4b   : > { %v344_v58 = vadd.s32 %v343_v31, %v333_v49  ;;  %v245_v27 = vsel %vm122_vm7, %v244_v28, %v1244_v33  ;;  %vm277_vm12 = vcmp.lt.s32.totalorder %v1126_v1, 0  ;;  %vm1276_vm13 = vcmp.le.f32.partialorder %v275_v4, 0.7853982 }
  0x4c   : > { %v225_v20 = vsel %vm223_vm3, %v224_v40, %v222_v55  ;;  %v367_v63 = vadd.s32 %v366_v62, %v357_v56  ;;  %v247_v44 = vsel %vm121_vm8, 0, %v245_v27  ;;  %vm263_vm2 = vweird.f32 %v1124_v0 }
  0x4d   : > { %v345_v60 = vadd.s32 %v344_v58, %v335_v21  ;;  %v226_v41 = vclz %v225_v20  ;;  %v264_v45 = vadd.s32 3, %v247_v44  ;;  %v574_v40 = vand.u32 3, %v247_v44 }
  0x4e   : > { %v371_v5 = vadd.s32 1, %v367_v63 }
  0x4f   : > { %vm370_vm4 = vc.u32 %v345_v60, %v364_v61  ;;  %v917_v10 = vadd.s32 4294967294, %v226_v41  ;;  %v369_v43 = vadd.s32 %v364_v61, %v345_v60  ;;  %v265_v57 = vand.u32 3, %v264_v45 }
  0x50   : > { %v372_v7 = vsel %vm370_vm4, %v371_v5, %v367_v63  ;;  %vm579_vm11 = vcmp.eq.s32.totalorder %v574_v40, 2  ;;  %vm576_vm0 = vcmp.eq.s32.totalorder %v574_v40, 0  ;;  %vm575_vm1 = vcmp.lt.s32.totalorder %v574_v40, 2 }
  0x51   : > { %vm918_vm5 = vcmp.lt.s32.totalorder %v917_v10, 0  ;;  %v373_v11 = vadd.s32 %v372_v7, %v368_v3  ;;  %vm270_vm10 = vcmp.eq.s32.totalorder %v265_v57, 2  ;;  %vm266_vm14 = vcmp.lt.s32.totalorder %v265_v57, 2 }
  0x52   : > { %v229_v8 = vsel %vm918_vm5, 0, %v917_v10  ;;  %vm267_vm15 = vcmp.eq.s32.totalorder %v265_v57, 0 }
  0x53   : > { %v230_v12 = vsub.s32 32, %v229_v8  ;;  %v231_v51 = vshll.u32 %v222_v55, %v229_v8  ;;  %v234_v13 = vsub.s32 4294967266, %v229_v8  ;;  %v374_v17 = vadd.s32 536870912, %v373_v11 }
  0x55   : > { %v232_v14 = vshrl.u32 %v214_v6, %v230_v12  ;;  %v235_v15 = vadd.s32 127, %v234_v13  ;;  %v1264_v22 = vshrl.u32 %v374_v17, 30 }
  0x57   : > { %v233_v18 = vor.u32 %v232_v14, %v231_v51  ;;  %v236_v19 = vshll.u32 %v235_v15, 23  ;;  %v376_v16 = vshll.u32 %v1264_v22, 30  ;;  %v399_v6 = vsub.s32 4, %v1264_v22 }
  0x59   : > { %v237_v34 = vor.u32 4788187, %v236_v19  ;;  %v240_v24 = vcvt.s32.f32 %v233_v18  ;;  %v377_v54 = vsub.s32 %v373_v11, %v376_v16  ;;  %v400_v14 = vsel %vm277_vm12, %v399_v6, %v1264_v22 }
  0x5b   : > { %v238_v25 = vand.u32 2147483647, %v237_v34  ;;  %vm378_vm6 = vcmp.lt.s32.totalorder %v377_v54, 0  ;;  %v379_v26 = vsub.s32 0, %v377_v54 }
  0x5d   : > { %v241_v59 = vmul.f32 %v240_v24, %v238_v25  ;;  %v380_v32 = vsel %vm378_vm6, %v379_v26, %v377_v54  ;;  %v402_v25 = vsel %vm1276_vm13, 0, %v400_v14 }
  0x5e   : > { %v381_v35 = vclz %v380_v32  ;;  %v419_v32 = vadd.s32 3, %v402_v25 }
  0x5f   : > { %v242_v30 = vxor.u32 2147483648, %v241_v59 }
  0x60   : > { %v920_v39 = vadd.s32 4294967294, %v381_v35  ;;  %v420_v44 = vand.u32 3, %v419_v32 }
  0x61   : > { %v243_v36 = vsel %vm122_vm7, %v242_v30, %v241_v59 }
  0x62   : > { %v246_v37 = vsel %vm121_vm8, %v1124_v0, %v243_v36  ;;  %vm921_vm9 = vcmp.lt.s32.totalorder %v920_v39, 0  ;;  %vm425_vm3 = vcmp.eq.s32.totalorder %v420_v44, 2  ;;  %vm421_vm5 = vcmp.lt.s32.totalorder %v420_v44, 2 }
  0x63   : > { %v248_v42 = vmul.f32 %v246_v37, %v246_v37  ;;  %v384_v47 = vsel %vm921_vm9, 0, %v920_v39  ;;  %vm422_vm6 = vcmp.eq.s32.totalorder %v420_v44, 0  ;;  %vm418_vm9 = vweird.f32 %v1126_v1 }
  0x64   : > { %v385_v48 = vsub.s32 32, %v384_v47  ;;  %v386_v49 = vshll.u32 %v377_v54, %v384_v47  ;;  %v389_v50 = vsub.s32 4294967266, %v384_v47 }
  0x65   : > { %v249_v38 = vmul.f32 -0.001358992, %v248_v42  ;;  %v256_v46 = vmul.f32 -0.00019511016, %v248_v42 }
  0x66   : > { %v387_v52 = vshrl.u32 %v369_v43, %v385_v48  ;;  %v390_v53 = vadd.s32 127, %v389_v50 }
  0x67   : > { %v250_v2 = vadd.f32 0.041655596, %v249_v38  ;;  %v257_v23 = vadd.f32 0.008332121, %v256_v46  ;;  %v728_v38 = vand.u32 3, %v402_v25 }
  0x68   : > { %v388_v29 = vor.u32 %v387_v52, %v386_v49  ;;  %v391_v21 = vshll.u32 %v390_v53, 23 }
  0x69   : > { %v251_v55 = vmul.f32 %v250_v2, %v248_v42  ;;  %v258_v33 = vmul.f32 %v257_v23, %v248_v42  ;;  %vm733_vm4 = vcmp.eq.s32.totalorder %v728_v38, 2  ;;  %vm730_vm7 = vcmp.eq.s32.totalorder %v728_v38, 0 }
  0x6a   : > { %v392_v58 = vor.u32 4788187, %v391_v21  ;;  %v395_v61 = vcvt.s32.f32 %v388_v29  ;;  %vm729_vm8 = vcmp.lt.s32.totalorder %v728_v38, 2 }
  0x6b   : > { %v252_v31 = vadd.f32 -0.4999988, %v251_v55  ;;  %v259_v56 = vadd.f32 -0.16666654, %v258_v33 }
  0x6c   : > { %v393_v20 = vand.u32 2147483647, %v392_v58 }
  0x6d   : > { %v253_v9 = vmul.f32 %v252_v31, %v248_v42  ;;  %v260_v62 = vmul.f32 %v259_v56, %v248_v42 }
  0x6e   : > { %v396_v63 = vmul.f32 %v395_v61, %v393_v20 }
  0x6f   : > { %v254_v60 = vadd.f32 1.0, %v253_v9  ;;  %v261_v41 = vadd.f32 1.0, %v260_v62 }
  0x70   : > { %v397_v7 = vxor.u32 2147483648, %v396_v63 }
  0x71   : > { %v262_v3 = vmul.f32 %v261_v41, %v246_v37  ;;  %v271_v10 = vxor.u32 2147483648, %v254_v60 }
  0x72   : > { %v398_v51 = vsel %vm277_vm12, %v397_v7, %v396_v63  ;;  %vm816_vm12 = vcmask 785408  }
  0x73   : > { %v268_v8 = vxor.u32 2147483648, %v262_v3  ;;  %v272_v11 = vsel %vm270_vm10, %v271_v10, %v262_v3  ;;  %v581_v12 = vsel %vm579_vm11, %v271_v10, %v262_v3  ;;  %v401_v15 = vsel %vm1276_vm13, %v1126_v1, %v398_v51 }
  0x74   : > { %v403_v19 = vmul.f32 %v401_v15, %v401_v15  ;;  %vm810_vm10 = vcmask 261120   ;;  %vm813_vm11 = vcmask 523264  }
  0x75   : > { %v269_v13 = vsel %vm267_vm15, %v254_v60, %v268_v8  ;;  %v578_v4 = vsel %vm576_vm0, %v254_v60, %v268_v8 }
  0x76   : > { %v273_v17 = vsel %vm266_vm14, %v269_v13, %v272_v11  ;;  %v582_v18 = vsel %vm575_vm1, %v578_v4, %v581_v12  ;;  %v404_v54 = vmul.f32 -0.001358992, %v403_v19  ;;  %v411_v59 = vmul.f32 -0.00019511016, %v403_v19 }
  0x77   : > { %v274_v34 = vsel %vm263_vm2, nan, %v273_v17  ;;  %v583_v24 = vsel %vm263_vm2, nan, %v582_v18 }
  0x78   : > { %764 = vrot.lane.b32.xlu0 %v274_v34, %s1057_s23  ;;  %v738_v16 = vmul.f32 2.0, %v274_v34  ;;  %772 = vrot.lane.b32.xlu2 %v583_v24, %s1058_s24  ;;  %v405_v28 = vadd.f32 0.041655596, %v404_v54  ;;  %v412_v30 = vadd.f32 0.008332121, %v411_v59 }
  0x7a   : > { %v740_v22 = vmul.f32 %v738_v16, %v583_v24  ;;  %v1294_v26 = vmul.f32 %v738_v16, %v274_v34  ;;  %v406_v36 = vmul.f32 %v405_v28, %v403_v19  ;;  %v413_v27 = vmul.f32 %v412_v30, %v403_v19 }
  0x7c   : > { %v744_v35 = vsub.f32 1.0, %v1294_v26  ;;  %v746_v37 = vmul.f32 2.0, %v740_v22  ;;  %v407_v39 = vadd.f32 -0.4999988, %v406_v36  ;;  %v414_v42 = vadd.f32 -0.16666654, %v413_v27 }
  0x7e   : > { %v748_v43 = vmul.f32 %v746_v37, %v744_v35  ;;  %v408_v46 = vmul.f32 %v407_v39, %v403_v19  ;;  %v415_v47 = vmul.f32 %v414_v42, %v403_v19  ;;  %v750_v57 = vmul.f32 %v746_v37, %v740_v22 }
  0x80   : > { %788 = vrot.lane.b32.xlu1 %v748_v43, %s1057_s23  ;;  %v409_v48 = vadd.f32 1.0, %v408_v46  ;;  %v416_v49 = vadd.f32 1.0, %v415_v47  ;;  %v752_v9 = vsub.f32 1.0, %v750_v57  ;;  %v754_v10 = vmul.f32 2.0, %v748_v43 }
  0x82   : > { %v417_v50 = vmul.f32 %v416_v49, %v401_v15  ;;  %v426_v2 = vxor.u32 2147483648, %v409_v48  ;;  %v756_v5 = vmul.f32 %v754_v10, %v752_v9  ;;  %v758_v6 = vmul.f32 %v754_v10, %v748_v43 }
  0x84   : > { %v423_v23 = vxor.u32 2147483648, %v417_v50  ;;  %v427_v45 = vsel %vm425_vm3, %v426_v2, %v417_v50  ;;  %v735_v52 = vsel %vm733_vm4, %v426_v2, %v417_v50  ;;  %v760_v8 = vsub.f32 1.0, %v758_v6 }
  0x86   : > { %v424_v53 = vsel %vm422_vm6, %v409_v48, %v423_v23  ;;  %v732_v55 = vsel %vm730_vm7, %v409_v48, %v423_v23  ;;  %827 = vst.msk [vmem:[%s1309_s28 + $0x10] sm:$0xff] %vm810_vm10, %v760_v8 }
  0x87   : > { %v428_v33 = vsel %vm421_vm5, %v424_v53, %v427_v45  ;;  %v736_v29 = vsel %vm729_vm8, %v732_v55, %v735_v52 }
  0x88   : > { %v429_v21 = vsel %vm418_vm9, nan, %v428_v33  ;;  %v737_v31 = vsel %vm418_vm9, nan, %v736_v29 }
  0x89   : > { %v739_v56 = vmul.f32 2.0, %v429_v21  ;;  %766 = vrot.lane.b32.xlu0 %v429_v21, %s1057_s23  ;;  %774 = vrot.lane.b32.xlu2 %v737_v31, %s1058_s24 }
  0x8b   : > { %v741_v40 = vmul.f32 %v739_v56, %v737_v31  ;;  %v743_v58 = vmul.f32 %v739_v56, %v429_v21 }
  0x8d   : > { %v745_v61 = vsub.f32 1.0, %v743_v58  ;;  %v747_v62 = vmul.f32 2.0, %v741_v40 }
  0x8f   : > { %v749_v20 = vmul.f32 %v747_v62, %v745_v61  ;;  %v751_v60 = vmul.f32 %v747_v62, %v741_v40 }
  0x91   : > { %796 = vrot.lane.b32.xlu0 %v752_v9, %s1058_s24  ;;  %790 = vrot.lane.b32.xlu1 %v749_v20, %s1057_s23  ;;  %v755_v41 = vmul.f32 2.0, %v749_v20  ;;  %v753_v63 = vsub.f32 1.0, %v751_v60 }
  0x92   : > { %780 = vrot.lane.b32.xlu2 %v740_v22, %s1059_s25 }
  0x93   : > { %v757_v3 = vmul.f32 %v755_v41, %v753_v63  ;;  %v759_v7 = vmul.f32 %v755_v41, %v749_v20 }
  0x95   : > { %v761_v11 = vsub.f32 1.0, %v759_v7 }
  0x97   : > { %830 = vst.msk [vmem:[%s1309_s28 + $0x28] sm:$0xff] %vm810_vm10, %v761_v11 }
  0x99   : > { %782 = vrot.lane.b32.xlu0 %v741_v40, %s1059_s25  ;;  %798 = vrot.lane.b32.xlu1 %v753_v63, %s1058_s24 }
  0x9a   : > { %806 = vrot.lane.b32.xlu2 %v757_v3, %s1059_s25 }
  0xa1   : > { %804 = vrot.lane.b32.xlu1 %v756_v5, %s1059_s25 }
  0xd2   : > { %v773_v12 = vpop.permute.xlu2 %772 }
  0xe3   : > { %v775_v51 = vpop.permute.xlu2 %774 }
  0xea   : > { %v765_v13 = vpop.permute.xlu0 %764 }
  0xeb   : > { %v811_v4 = vsel %vm810_vm10, %v1124_v0, %v765_v13 }
  0xec   : > { %v814_v14 = vsel %vm813_vm11, %v811_v4, %v773_v12  ;;  %v781_v15 = vpop.permute.xlu2 %780 }
  0xed   : > { %v817_v17 = vsel %vm816_vm12, %v814_v14, %v781_v15 }
  0xee   : > { %825 = vst [vmem:[%s1309_s28] sm:$0xff] %v817_v17 }
  0xf2   : > { %v789_v18 = vpop.permute.xlu1 %788 }
  0xf3   : > { %v819_v32 = vsel %vm810_vm10, %v744_v35, %v789_v18 }
  0xf4   : > { %v807_v25 = vpop.permute.xlu2 %806 }
  0xfb   : > { %v767_v19 = vpop.permute.xlu0 %766 }
  0xfc   : > { %v812_v16 = vsel %vm810_vm10, %v1126_v1, %v767_v19 }
  0xfd   : > { %v815_v54 = vsel %vm813_vm11, %v812_v16, %v775_v51 }
 0x103   : > { %v797_v34 = vpop.permute.xlu0 %796  ;;  %v791_v24 = vpop.permute.xlu1 %790 }
 0x104   : > { %v820_v0 = vsel %vm810_vm10, %v745_v61, %v791_v24  ;;  %v821_v36 = vsel %vm813_vm11, %v819_v32, %v797_v34 }
 0x10b   : > { %v783_v59 = vpop.permute.xlu0 %782  ;;  %v799_v22 = vpop.permute.xlu1 %798 }
 0x10c   : > { %v818_v28 = vsel %vm816_vm12, %v815_v54, %v783_v59  ;;  %v822_v30 = vsel %vm813_vm11, %v820_v0, %v799_v22 }
 0x10d   : > { %828 = vst [vmem:[%s1309_s28 + $0x18] sm:$0xff] %v818_v28  ;;  %v824_v1 = vsel %vm816_vm12, %v822_v30, %v807_v25 }
 0x10e   : > { %829 = vst [vmem:[%s1309_s28 + $0x20] sm:$0xff] %v824_v1 }
 0x113   : > { %v805_v27 = vpop.permute.xlu1 %804 }
 0x114   : > { %v823_v37 = vsel %vm816_vm12, %v821_v36, %v805_v27 }
 0x115   : > { %826 = vst [vmem:[%s1309_s28 + $0x8] sm:$0xff] %v823_v37 }
 0x116   : > { %1013 = shalt.err (!%p1010_p3)
}
 0x117   : > { %s1060_s22 = smov 384   ;;  %s1061_s23 = smov 24  }
 0x118   : > { %935 = dma.vmem_to_hbm [thread:$0]  (%p1110_p5), %s846_s4, 768, %s848_s5, %s832_s10, %s1060_s22, %s1060_s22, %s1061_s23  }
 0x119 PF: > { %p941_p4 = scmp.ge.s32.totalorder %s1048_s9, 2  ;;  %s862_s24 = sand.u32 1, %s1036_s6  }
 0x11a   : > { %s863_s25 = scalar_lea.sflag [#allocation3], %s862_s24 }
 0x11b   : > { %p938_p7 = pnand %p941_p4, %p1114_p6 }
 0x11d   : > { %p939_p8 = pneg %p938_p7 }
 0x11f   : > { %1031 = dma.done.wait (%p939_p8), %s863_s25, 768  }
 0x120   : > { %1033 = vsyncadd (%p939_p8), %s863_s25, 4294966528  ;;  %p11_p9 = scmp.ge.s32.totalorder %s1097_s12, 6   ;;  %s1375_s6 = smov %s1040_s7 }
 0x121   : > { %s1376_s7 = smov %s1044_s8  ;;  %s1377_s8 = smov %s1108_s15 }
 0x122   : > { %s1378_s9 = smov %s1097_s12  ;;  %13 = sbr.rel (!%p11_p9) target bundleno = 3 (0x3), region = 59 }
 0x127   :  { %869 = vsyncpa [#allocation3], 1 }
 0x128   :  { %871 = vsyncpa [#allocation3 + $0x1], 1 }

</bundles_post_ra>
